<compile_context>
chip_gen: v7x
topology: tpu7x:2x2x1
jax: 0.10.0
libtpu: 0.0.40
codegen_flags: <defaults>
</compile_context>

<pallas_src>
import functools

import jax
import jax.numpy as jnp
from jax.experimental import pallas as pl
from jax.experimental.pallas import tpu as pltpu


def fixed_hidden_mlp_kernel(x_ref, wl_ref, bl_ref, wr_ref, ones_ref,
                            sum_ref, abs_ref, *, n_valid, tb, lanes):
    """One batch tile: linear -> relu(X@R + 1) -> linear -> partial reductions.

    x_ref    : (TB, 128)  zero-padded inputs (real features in lanes [0, 20))
    wl_ref   : (128, 128) shared linear weight (stored as (in, out), padded)
    bl_ref   : (1, 128)   shared linear bias (zero-padded)
    wr_ref   : (128, 128) fixed rand_weight (zero-padded)
    ones_ref : (1, 128)   1.0 on the real lanes, 0.0 on padded lanes
    sum_ref  : (8, 128)   per-tile partial sums   (grand total = global sum)
    abs_ref  : (8, 128)   per-tile partial |.| sums
    """
    i = pl.program_id(0)
    x = x_ref[...]                                                   # (TB, 128)

    # X = linear(X)
    h = jnp.dot(x, wl_ref[...], preferred_element_type=jnp.float32) + bl_ref[...]
    # X = relu(X @ rand_weight + 1)   ("+1" only on real lanes -> pads stay 0)
    h = jnp.dot(h, wr_ref[...], preferred_element_type=jnp.float32) + ones_ref[...]
    h = jnp.maximum(h, 0.0)
    # X = linear(X)   (same shared weights again)
    h = jnp.dot(h, wl_ref[...], preferred_element_type=jnp.float32) + bl_ref[...]

    # Mask batch-padding rows: zero-padded input rows still pick up the bias
    # and would otherwise pollute the global reductions.
    row = jax.lax.broadcasted_iota(jnp.int32, (tb, lanes), 0) + i * tb
    h = jnp.where(row < n_valid, h, 0.0)

    # Fold (TB, 128) -> (8, 128) partial sums: adding TB//8 native (8,128)
    # vregs is pure VALU work and keeps the output block (8,128)-dense.
    sum_ref[...] = h.reshape(tb // 8, 8, lanes).sum(axis=0)
    abs_ref[...] = jnp.abs(h).reshape(tb // 8, 8, lanes).sum(axis=0)


def fixed_hidden_mlp(x, w_linear, b_linear, rand_weight, *, tile_b=128, lanes=128):
    """Pallas implementation of FixedHiddenMLP.forward.

    w_linear is stored as (in_features, out_features) == torch weight.T so the
    kernel computes y = x @ W + b.  Returns a scalar (X.sum() after halving).
    """
    B, F = x.shape
    assert w_linear.shape == (F, F) and rand_weight.shape == (F, F)
    assert lanes % 128 == 0 and F <= lanes

    # Clamp the batch tile to the (8-aligned) real batch: tiny batches do one
    # thin tile instead of a mostly-padded 128-row tile; large batches keep
    # 128-row tiles (biggest lane-dense tile that comfortably fits VMEM).
    b_aligned = ((B + 7) // 8) * 8
    tile_b = max(8, min(tile_b, b_aligned))
    assert tile_b % 8 == 0

    n_tiles = pl.cdiv(B, tile_b)
    Bp = n_tiles * tile_b

    # Zero-pad everything to lane-dense 128-wide slabs (layout plumbing only).
    xp   = jnp.zeros((Bp, lanes), jnp.float32).at[:B, :F].set(x.astype(jnp.float32))
    wlp  = jnp.zeros((lanes, lanes), jnp.float32).at[:F, :F].set(w_linear.astype(jnp.float32))
    blp  = jnp.zeros((1, lanes), jnp.float32).at[:, :F].set(b_linear.reshape(1, F).astype(jnp.float32))
    wrp  = jnp.zeros((lanes, lanes), jnp.float32).at[:F, :F].set(rand_weight.astype(jnp.float32))
    ones = jnp.zeros((1, lanes), jnp.float32).at[:, :F].set(1.0)

    kernel = functools.partial(fixed_hidden_mlp_kernel,
                               n_valid=B, tb=tile_b, lanes=lanes)

    flops = 3 * 2 * Bp * lanes * lanes
    bytes_accessed = 4 * (Bp * lanes + 2 * lanes * lanes + 2 * lanes
                          + 2 * n_tiles * 8 * lanes)

    out_sum, out_abs = pl.pallas_call(
        kernel,
        out_shape=(jax.ShapeDtypeStruct((n_tiles * 8, lanes), jnp.float32),
                   jax.ShapeDtypeStruct((n_tiles * 8, lanes), jnp.float32)),
        grid=(n_tiles,),
        in_specs=[
            pl.BlockSpec((tile_b, lanes), lambda i: (i, 0)),   # x: tiled batch
            pl.BlockSpec((lanes, lanes), lambda i: (0, 0)),    # shared W (resident)
            pl.BlockSpec((1, lanes), lambda i: (0, 0)),        # shared b (resident)
            pl.BlockSpec((lanes, lanes), lambda i: (0, 0)),    # rand_weight (resident)
            pl.BlockSpec((1, lanes), lambda i: (0, 0)),        # masked ones (resident)
        ],
        out_specs=(pl.BlockSpec((8, lanes), lambda i: (i, 0)),
                   pl.BlockSpec((8, lanes), lambda i: (i, 0))),
        compiler_params=pltpu.CompilerParams(
            dimension_semantics=("parallel",)),                # v7x: both TCs
        cost_estimate=pl.CostEstimate(flops=flops, transcendentals=0,
                                      bytes_accessed=bytes_accessed),
    )(xp, wlp, blp, wrp, ones)

    s = jnp.sum(out_sum)   # padded rows/lanes contribute exactly 0
    a = jnp.sum(out_abs)

    # TODO(synk): the data-dependent `while X.abs().sum() > 1: X /= 2` loop has
    # a runtime trip count, so it runs here on two scalars (lax.while_loop);
    # halving by 2 is exact in fp32, so this is equivalent to halving the full
    # tensor each iteration as the PyTorch module does.
    def cond(carry):
        return carry[1] > 1.0

    def body(carry):
        return (carry[0] * 0.5, carry[1] * 0.5)

    s, _ = jax.lax.while_loop(cond, body, (s, a))
    return s   # X.sum()


if __name__ == "__main__":
    key = jax.random.PRNGKey(0)
    k_x, k_w, k_b, k_r = jax.random.split(key, 4)

    batch, feat = 8, 20
    x = jax.random.normal(k_x, (batch, feat), dtype=jnp.float32)

    # nn.Linear(20, 20)-style init; weight stored as (in, out) == torch weight.T
    bound = 1.0 / jnp.sqrt(jnp.float32(feat))
    w_linear = jax.random.uniform(k_w, (feat, feat), jnp.float32, -bound, bound)
    b_linear = jax.random.uniform(k_b, (feat,), jnp.float32, -bound, bound)
    rand_weight = jax.random.uniform(k_r, (feat, feat), jnp.float32)  # torch.rand

    out = jax.jit(fixed_hidden_mlp)(x, w_linear, b_linear, rand_weight)
    out = jax.block_until_ready(out)

    # Pure-JAX reference of the same math.
    ref = x @ w_linear + b_linear
    ref = jnp.maximum(ref @ rand_weight + 1.0, 0.0)
    ref = ref @ w_linear + b_linear
    ref = jax.lax.while_loop(lambda t: jnp.sum(jnp.abs(t)) > 1.0,
                             lambda t: t * 0.5, ref)
    ref_out = jnp.sum(ref)

    assert out.shape == ()
    assert jnp.allclose(out, ref_out, atol=1e-5, rtol=1e-4), (out, ref_out)

    print("KERNEL_OK")
</pallas_src>

<mosaic_0001>
module attributes {stable_mosaic.version = 11 : i64} {
  func.func @fixed_hidden_mlp_kernel(%arg0: i32, %arg1: memref<8x128xf32, #tpu.memory_space<vmem>>, %arg2: memref<128x128xf32, #tpu.memory_space<vmem>>, %arg3: memref<1x128xf32, #tpu.memory_space<vmem>>, %arg4: memref<128x128xf32, #tpu.memory_space<vmem>>, %arg5: memref<1x128xf32, #tpu.memory_space<vmem>>, %arg6: memref<8x128xf32, #tpu.memory_space<vmem>>, %arg7: memref<8x128xf32, #tpu.memory_space<vmem>>) attributes {dimension_semantics = [#tpu.dimension_semantics<parallel>], iteration_bounds = array<i64: 1>, scalar_prefetch = 0 : i64, scratch_operands = 0 : i64, tpu.core_type = #tpu.core_type<tc>, window_params = [{transform_indices = @transform_0, window_bounds = array<i64: 8, 128>}, {pipeline_mode = #tpu.pipeline_mode<synchronous>, transform_indices = @transform_1, window_bounds = array<i64: 128, 128>}, {pipeline_mode = #tpu.pipeline_mode<synchronous>, transform_indices = @transform_2, window_bounds = array<i64: 1, 128>}, {pipeline_mode = #tpu.pipeline_mode<synchronous>, transform_indices = @transform_3, window_bounds = array<i64: 128, 128>}, {pipeline_mode = #tpu.pipeline_mode<synchronous>, transform_indices = @transform_4, window_bounds = array<i64: 1, 128>}, {transform_indices = @transform_5, window_bounds = array<i64: 8, 128>}, {transform_indices = @transform_6, window_bounds = array<i64: 8, 128>}]} {
    %c0 = arith.constant 0 : index
    %c0_0 = arith.constant 0 : index
    %0 = vector.load %arg1[%c0, %c0_0] : memref<8x128xf32, #tpu.memory_space<vmem>>, vector<8x128xf32>
    %c0_1 = arith.constant 0 : index
    %c0_2 = arith.constant 0 : index
    %1 = vector.load %arg2[%c0_1, %c0_2] : memref<128x128xf32, #tpu.memory_space<vmem>>, vector<128x128xf32>
    %cst = arith.constant dense<0.000000e+00> : vector<8x128xf32>
    %2 = tpu.matmul %0, %1, %cst {dimension_numbers = #tpu.dot_dimension_numbers<[1], [0], [0], [1], [0, 0, 1, 1], [], []>} : vector<8x128xf32>, vector<128x128xf32>, vector<8x128xf32> -> vector<8x128xf32>
    %c0_3 = arith.constant 0 : index
    %c0_4 = arith.constant 0 : index
    %3 = vector.load %arg3[%c0_3, %c0_4] : memref<1x128xf32, #tpu.memory_space<vmem>>, vector<1x128xf32>
    %4 = vector.broadcast %3 : vector<1x128xf32> to vector<8x128xf32>
    %5 = arith.addf %2, %4 : vector<8x128xf32>
    %c0_5 = arith.constant 0 : index
    %c0_6 = arith.constant 0 : index
    %6 = vector.load %arg4[%c0_5, %c0_6] : memref<128x128xf32, #tpu.memory_space<vmem>>, vector<128x128xf32>
    %cst_7 = arith.constant dense<0.000000e+00> : vector<8x128xf32>
    %7 = tpu.matmul %5, %6, %cst_7 {dimension_numbers = #tpu.dot_dimension_numbers<[1], [0], [0], [1], [0, 0, 1, 1], [], []>} : vector<8x128xf32>, vector<128x128xf32>, vector<8x128xf32> -> vector<8x128xf32>
    %c0_8 = arith.constant 0 : index
    %c0_9 = arith.constant 0 : index
    %8 = vector.load %arg5[%c0_8, %c0_9] : memref<1x128xf32, #tpu.memory_space<vmem>>, vector<1x128xf32>
    %9 = vector.broadcast %8 : vector<1x128xf32> to vector<8x128xf32>
    %10 = arith.addf %7, %9 : vector<8x128xf32>
    %cst_10 = arith.constant 0.000000e+00 : f32
    %11 = vector.broadcast %cst_10 : f32 to vector<8x128xf32>
    %12 = arith.maximumf %10, %11 : vector<8x128xf32>
    %c0_11 = arith.constant 0 : index
    %c0_12 = arith.constant 0 : index
    %13 = vector.load %arg2[%c0_11, %c0_12] : memref<128x128xf32, #tpu.memory_space<vmem>>, vector<128x128xf32>
    %cst_13 = arith.constant dense<0.000000e+00> : vector<8x128xf32>
    %14 = tpu.matmul %12, %13, %cst_13 {dimension_numbers = #tpu.dot_dimension_numbers<[1], [0], [0], [1], [0, 0, 1, 1], [], []>} : vector<8x128xf32>, vector<128x128xf32>, vector<8x128xf32> -> vector<8x128xf32>
    %c0_14 = arith.constant 0 : index
    %c0_15 = arith.constant 0 : index
    %15 = vector.load %arg3[%c0_14, %c0_15] : memref<1x128xf32, #tpu.memory_space<vmem>>, vector<1x128xf32>
    %16 = vector.broadcast %15 : vector<1x128xf32> to vector<8x128xf32>
    %17 = arith.addf %14, %16 : vector<8x128xf32>
    %18 = tpu.iota {dimensions = array<i32: 0>} : vector<8x128xi32>
    %c8_i32 = arith.constant 8 : i32
    %19 = arith.muli %arg0, %c8_i32 : i32
    %20 = vector.broadcast %19 : i32 to vector<8x128xi32>
    %21 = arith.addi %18, %20 : vector<8x128xi32>
    %c8_i32_16 = arith.constant 8 : i32
    %22 = vector.broadcast %c8_i32_16 : i32 to vector<8x128xi32>
    %23 = arith.cmpi slt, %21, %22 : vector<8x128xi32>
    %cst_17 = arith.constant 0.000000e+00 : f32
    %24 = vector.broadcast %cst_17 : f32 to vector<8x128xf32>
    %25 = arith.select %23, %17, %24 : vector<8x128xi1>, vector<8x128xf32>
    %26 = vector.shape_cast %25 : vector<8x128xf32> to vector<1x8x128xf32>
    %cst_18 = arith.constant dense<0.000000e+00> : vector<8x128xf32>
    %27 = vector.multi_reduction <add>, %26, %cst_18 [0] : vector<1x8x128xf32> to vector<8x128xf32>
    %c0_19 = arith.constant 0 : index
    %c0_20 = arith.constant 0 : index
    %28 = vector.load %arg6[%c0_19, %c0_20] : memref<8x128xf32, #tpu.memory_space<vmem>>, vector<8x128xf32>
    tpu.vector_store %arg6[%c0_19, %c0_20], %27 {strides = array<i32>} : memref<8x128xf32, #tpu.memory_space<vmem>>, vector<8x128xf32>,
    %29 = math.absf %25 : vector<8x128xf32>
    %30 = vector.shape_cast %29 : vector<8x128xf32> to vector<1x8x128xf32>
    %cst_21 = arith.constant dense<0.000000e+00> : vector<8x128xf32>
    %31 = vector.multi_reduction <add>, %30, %cst_21 [0] : vector<1x8x128xf32> to vector<8x128xf32>
    %c0_22 = arith.constant 0 : index
    %c0_23 = arith.constant 0 : index
    %32 = vector.load %arg7[%c0_22, %c0_23] : memref<8x128xf32, #tpu.memory_space<vmem>>, vector<8x128xf32>
    tpu.vector_store %arg7[%c0_22, %c0_23], %31 {strides = array<i32>} : memref<8x128xf32, #tpu.memory_space<vmem>>, vector<8x128xf32>,
    return
  }
  func.func @transform_0(%arg0: i32) -> (i32, i32) {
    %c0_i32 = arith.constant 0 : i32
    %c0_i32_0 = arith.constant 0 : i32
    return %arg0, %c0_i32 : i32, i32
  }
  func.func @transform_1(%arg0: i32) -> (i32, i32) {
    %c0_i32 = arith.constant 0 : i32
    %c0_i32_0 = arith.constant 0 : i32
    %c0_i32_1 = arith.constant 0 : i32
    return %c0_i32, %c0_i32_0 : i32, i32
  }
  func.func @transform_2(%arg0: i32) -> (i32, i32) {
    %c0_i32 = arith.constant 0 : i32
    %c0_i32_0 = arith.constant 0 : i32
    %c0_i32_1 = arith.constant 0 : i32
    return %c0_i32, %c0_i32_0 : i32, i32
  }
  func.func @transform_3(%arg0: i32) -> (i32, i32) {
    %c0_i32 = arith.constant 0 : i32
    %c0_i32_0 = arith.constant 0 : i32
    %c0_i32_1 = arith.constant 0 : i32
    return %c0_i32, %c0_i32_0 : i32, i32
  }
  func.func @transform_4(%arg0: i32) -> (i32, i32) {
    %c0_i32 = arith.constant 0 : i32
    %c0_i32_0 = arith.constant 0 : i32
    %c0_i32_1 = arith.constant 0 : i32
    return %c0_i32, %c0_i32_0 : i32, i32
  }
  func.func @transform_5(%arg0: i32) -> (i32, i32) {
    %c0_i32 = arith.constant 0 : i32
    %c0_i32_0 = arith.constant 0 : i32
    return %arg0, %c0_i32 : i32, i32
  }
  func.func @transform_6(%arg0: i32) -> (i32, i32) {
    %c0_i32 = arith.constant 0 : i32
    %c0_i32_0 = arith.constant 0 : i32
    return %arg0, %c0_i32 : i32, i32
  }
}

</mosaic_0001>

<bundles_post_ra>
// kernel: fixed_hidden_mlp.1
= control target key start
LH: loop header
LB: loop body
LE: loop exit
PB: predicated region body
PF: predicated region fallthrough
CT: control target
= control target key end

     0   :  { %v533_v0 = vmov 0.0|0.0   ;;  %vm534_vm0 = vmmov 0   ;;  %v535_v4 = vmov 0.0   ;;  %s724_s1 = inlined_call_operand.vmem [shape: f32[128,128], index: 1, kind: input, shape index: {}]   ;;  %s725_s3 = inlined_call_operand.vmem [shape: f32[128,128], index: 3, kind: input, shape index: {}]   ;;  %s726_s0 = inlined_call_operand.vmem [shape: f32[8,128], index: 0, kind: input, shape index: {}]   ;;  %s727_s2 = inlined_call_operand.vmem [shape: f32[1,128], index: 2, kind: input, shape index: {}]   ;;  %s728_s4 = inlined_call_operand.vmem [shape: f32[1,128], index: 4, kind: input, shape index: {}]   ;;  %s729_s5 = inlined_call_operand.vmem [shape: f32[8,128], index: 5, kind: output, shape index: {0}]   ;;  %s730_s6 = inlined_call_operand.vmem [shape: f32[8,128], index: 6, kind: output, shape index: {1}]  }
   0x1   :  { %458 = vmatprep.subr.bf16.mxu0 %v533_v0  ;;  %v23_v1 = vld [vmem:[%s724_s1] sm:$0xff]  ;;  %v24_v2 = vld [vmem:[%s724_s1 + $0x8] sm:$0xff]  ;;  %v25_v3 = vld [vmem:[%s724_s1 + $0x10] sm:$0xff]  ;;  %385 = vmatprep.mubr.msk.f32.mxu0 %vm534_vm0, %v535_v4 }
   0x2   :  { %v583_v5 = vpack.c.bf16 %v24_v2, %v23_v1  ;;  %v26_v6 = vld [vmem:[%s724_s1 + $0x18] sm:$0xff]  ;;  %482 = vmatprep.subr.bf16.mxu1 %v533_v0  ;;  %420 = vmatprep.mubr.msk.f32.mxu1 %vm534_vm0, %v535_v4  ;;  %v27_v8 = vld [vmem:[%s724_s1 + $0x20] sm:$0xff]  ;;  %v28_v9 = vld [vmem:[%s724_s1 + $0x28] sm:$0xff] }
   0x3   :  { %v592_v7 = vpack.c.bf16 %v26_v6, %v25_v3  ;;  %v116_v10 = vld [vmem:[%s725_s3] sm:$0xff]  ;;  %v117_v11 = vld [vmem:[%s725_s3 + $0x8] sm:$0xff]  ;;  %v118_v12 = vld [vmem:[%s725_s3 + $0x10] sm:$0xff]  ;;  %v614_v14 = vpack.c.bf16 %v28_v9, %v27_v8 }
   0x4   :  { %460 = vmatpush3.bf16.msra.mxu0 %v583_v5  ;;  %v119_v13 = vld [vmem:[%s725_s3 + $0x18] sm:$0xff]  ;;  %v483_v15 = vpack.c.bf16 %v117_v11, %v116_v10  ;;  %v29_v16 = vld [vmem:[%s724_s1 + $0x30] sm:$0xff]  ;;  %v120_v19 = vld [vmem:[%s725_s3 + $0x20] sm:$0xff] }
   0x5   :  { %461 = vmatprep.subr.bf16.mxu0 %v533_v0  ;;  %v30_v17 = vld [vmem:[%s724_s1 + $0x38] sm:$0xff]  ;;  %v486_v18 = vpack.c.bf16 %v119_v13, %v118_v12  ;;  %v121_v20 = vld [vmem:[%s725_s3 + $0x28] sm:$0xff]  ;;  %v31_v22 = vld [vmem:[%s724_s1 + $0x40] sm:$0xff] }
   0x6   :  { %484 = vmatpush3.bf16.msra.mxu1 %v483_v15  ;;  %v468_v21 = vpack.c.bf16 %v30_v17, %v29_v16  ;;  %v32_v23 = vld [vmem:[%s724_s1 + $0x48] sm:$0xff]  ;;  %v489_v24 = vpack.c.bf16 %v121_v20, %v120_v19  ;;  %v122_v25 = vld [vmem:[%s725_s3 + $0x30] sm:$0xff]  ;;  %v123_v26 = vld [vmem:[%s725_s3 + $0x38] sm:$0xff] }
   0x7   :  { %485 = vmatprep.subr.bf16.mxu1 %v533_v0  ;;  %v471_v27 = vpack.c.bf16 %v32_v23, %v31_v22  ;;  %v33_v28 = vld [vmem:[%s724_s1 + $0x50] sm:$0xff]  ;;  %v34_v29 = vld [vmem:[%s724_s1 + $0x58] sm:$0xff]  ;;  %v492_v30 = vpack.c.bf16 %v123_v26, %v122_v25  ;;  %v124_v31 = vld [vmem:[%s725_s3 + $0x40] sm:$0xff] }
   0x8   :  { %463 = vmatpush3.bf16.msra.mxu0 %v592_v7  ;;  %v125_v32 = vld [vmem:[%s725_s3 + $0x48] sm:$0xff]  ;;  %v474_v33 = vpack.c.bf16 %v34_v29, %v33_v28  ;;  %v35_v34 = vld [vmem:[%s724_s1 + $0x60] sm:$0xff]  ;;  %v126_v37 = vld [vmem:[%s725_s3 + $0x50] sm:$0xff] }
   0x9   :  { %464 = vmatprep.subr.bf16.mxu0 %v533_v0  ;;  %v36_v35 = vld [vmem:[%s724_s1 + $0x68] sm:$0xff]  ;;  %v495_v36 = vpack.c.bf16 %v125_v32, %v124_v31  ;;  %v127_v38 = vld [vmem:[%s725_s3 + $0x58] sm:$0xff]  ;;  %v37_v40 = vld [vmem:[%s724_s1 + $0x70] sm:$0xff] }
   0xa   :  { %487 = vmatpush3.bf16.msra.mxu1 %v486_v18  ;;  %v477_v39 = vpack.c.bf16 %v36_v35, %v35_v34  ;;  %v38_v41 = vld [vmem:[%s724_s1 + $0x78] sm:$0xff]  ;;  %v498_v42 = vpack.c.bf16 %v127_v38, %v126_v37  ;;  %v128_v43 = vld [vmem:[%s725_s3 + $0x60] sm:$0xff]  ;;  %v129_v44 = vld [vmem:[%s725_s3 + $0x68] sm:$0xff] }
   0xb   :  { %488 = vmatprep.subr.bf16.mxu1 %v533_v0  ;;  %v480_v45 = vpack.c.bf16 %v38_v41, %v37_v40  ;;  %v501_v46 = vpack.c.bf16 %v129_v44, %v128_v43  ;;  %v22_v47 = vld [vmem:[%s726_s0] sm:$0xff]  ;;  %v130_v48 = vld [vmem:[%s725_s3 + $0x70] sm:$0xff]  ;;  %v131_v49 = vld [vmem:[%s725_s3 + $0x78] sm:$0xff] }
   0xc   :  { %466 = vmatpush3.bf16.msra.mxu0 %v614_v14  ;;  %v504_v50 = vpack.c.bf16 %v131_v49, %v130_v48  ;;  %v300_v51 = vld [vmem:[%s727_s2] ss:$0 sm:$0xff] }
   0xd   :  { %467 = vmatprep.subr.bf16.mxu0 %v533_v0  ;;  %v301_v55 = vld [vmem:[%s728_s4] ss:$0 sm:$0xff] }
   0xe   :  { %490 = vmatpush3.bf16.msra.mxu1 %v489_v24 }
   0xf   :  { %491 = vmatprep.subr.bf16.mxu1 %v533_v0 }
  0x10   :  { %469 = vmatpush3.bf16.msra.mxu0 %v468_v21 }
  0x11   :  { %470 = vmatprep.subr.bf16.mxu0 %v533_v0 }
  0x12   :  { %493 = vmatpush3.bf16.msra.mxu1 %v492_v30 }
  0x13   :  { %494 = vmatprep.subr.bf16.mxu1 %v533_v0 }
  0x14   :  { %472 = vmatpush3.bf16.msra.mxu0 %v471_v27 }
  0x15   :  { %473 = vmatprep.subr.bf16.mxu0 %v533_v0 }
  0x16   :  { %496 = vmatpush3.bf16.msra.mxu1 %v495_v36 }
  0x17   :  { %497 = vmatprep.subr.bf16.mxu1 %v533_v0 }
  0x18   :  { %475 = vmatpush3.bf16.msra.mxu0 %v474_v33 }
  0x19   :  { %476 = vmatprep.subr.bf16.mxu0 %v533_v0 }
  0x1a   :  { %499 = vmatpush3.bf16.msra.mxu1 %v498_v42 }
  0x1b   :  { %500 = vmatprep.subr.bf16.mxu1 %v533_v0 }
  0x1c   :  { %478 = vmatpush3.bf16.msra.mxu0 %v477_v39 }
  0x1d   :  { %479 = vmatprep.subr.bf16.mxu0 %v533_v0 }
  0x1e   :  { %502 = vmatpush3.bf16.msra.mxu1 %v501_v46 }
  0x1f   :  { %503 = vmatprep.subr.bf16.mxu1 %v533_v0 }
  0x20   :  { %481 = vmatpush3.bf16.msra.mxu0 %v480_v45 }
  0x21   :  { %506 = vmatprep.subr.bf16.mxu0 %v533_v0 }
  0x22   :  { %505 = vmatpush3.bf16.msra.mxu1 %v504_v50 }
  0x23   :  { %386 = vmatmul.mubr.f32.vlgmr.msra.gmra.mrb[0].mxu0 %v22_v47 }
  0x24   :  { %508 = vmatpush3.bf16.msra.mxu0 %v583_v5  ;;  %455 = vmatprep.mubr.msk.f32.mxu0 %vm534_vm0, %v535_v4 }
  0x25   :  { %509 = vmatprep.subr.bf16.mxu0 %v533_v0 }
  0x28   :  { %511 = vmatpush3.bf16.msra.mxu0 %v592_v7 }
  0x29   :  { %512 = vmatprep.subr.bf16.mxu0 %v533_v0 }
  0x2c   :  { %514 = vmatpush3.bf16.msra.mxu0 %v614_v14 }
  0x2d   :  { %515 = vmatprep.subr.bf16.mxu0 %v533_v0 }
  0x30   :  { %517 = vmatpush3.bf16.msra.mxu0 %v468_v21 }
  0x31   :  { %518 = vmatprep.subr.bf16.mxu0 %v533_v0 }
  0x34   :  { %520 = vmatpush3.bf16.msra.mxu0 %v471_v27 }
  0x35   :  { %521 = vmatprep.subr.bf16.mxu0 %v533_v0 }
  0x38   :  { %523 = vmatpush3.bf16.msra.mxu0 %v474_v33 }
  0x39   :  { %524 = vmatprep.subr.bf16.mxu0 %v533_v0 }
  0x3c   :  { %526 = vmatpush3.bf16.msra.mxu0 %v477_v39 }
  0x3d   :  { %527 = vmatprep.subr.bf16.mxu0 %v533_v0 }
  0x40   :  { %529 = vmatpush3.bf16.msra.mxu0 %v480_v45 }
  0xf6   :  { %v112_v52 = vpop.f32.mrb[0].mxu0 }
  0xf7   :  { %v113_v53 = vadd.f32 %v300_v51, %v112_v52  ;;  %v387_v54 = vpop.f32.mrb[1].mxu0 }
  0xf9   :  { %421 = vmatmul.mubr.f32.vlgmr.msra.gmra.mrb[0].mxu1 %v113_v53 }
 0x1cc   :  { %v205_v56 = vpop.f32.mrb[0].mxu1 }
 0x1cd   :  { %v206_v57 = vadd.f32 %v301_v55, %v205_v56  ;;  %v422_v58 = vpop.f32.mrb[1].mxu1 }
 0x1cf   :  { %v209_v59 = vmax.f32 %v206_v57, 0.0 }
 0x1d1   :  { %456 = vmatmul.mubr.f32.vlgmr.msra.gmra.mrb[2].mxu0 %v209_v59 }
 0x2a4   :  { %v276_v60 = vpop.f32.mrb[2].mxu0 }
 0x2a5   :  { %v277_v61 = vadd.f32 %v300_v51, %v276_v60  ;;  %v457_v62 = vpop.f32.mrb[3].mxu0 }
 0x2a7   :  { %288 = vst [vmem:[%s729_s5] sm:$0xff] %v277_v61  ;;  %v289_v63 = vand.u32 2147483647, %v277_v61 }
 0x2a9   :  { %291 = vst [vmem:[%s730_s6] sm:$0xff] %v289_v63 }

</bundles_post_ra>
